<compile_context>
chip_gen: v6e
topology: v6e:2x2x1
jax: 0.10.0
libtpu: 0.0.40
codegen_flags: <defaults>
</compile_context>

<pallas_src>
import jax
import jax.numpy as jnp
from jax.experimental import pallas as pl
from jax.experimental.pallas import tpu as pltpu


IN_FEATURES = 500   # Linear(500, 100) input width (kept unpadded on the x stream)
H_PAD = 128         # hidden widths 100 / 50 padded up to one lane group


def fcn_kernel(x_ref, w1_ref, wmid_ref, bias_ref, w5_ref, b5_ref, o_ref):
    """Forward of the full 5-layer MLP for one batch tile.

    x_ref    : (tile_b, 500)  f32   (cast to bf16 in-kernel)
    w1_ref   : (500, 128)     bf16
    wmid_ref : (3, 128, 128)  bf16  (layers 2..4, zero padded)
    bias_ref : (4, 128)       f32   (biases of layers 1..4, zero padded)
    w5_ref   : (1, 128)       f32   (last layer weight row, zero padded)
    b5_ref   : (1, 1)         f32
    o_ref    : (tile_b, 1)    f32
    """
    cdt = w1_ref.dtype  # MXU compute dtype (bf16)

    # Layer 1: (tile_b, 500) @ (500, 128) on the MXU, f32 accumulation.
    x = x_ref[...].astype(cdt)
    h = jnp.dot(x, w1_ref[...], preferred_element_type=jnp.float32)
    h = jnp.maximum(h + bias_ref[0:1, :], 0.0)

    # Layers 2..4: (tile_b, 128) @ (128, 128), statically unrolled.
    for k in range(3):
        h = jnp.dot(h.astype(cdt), wmid_ref[k], preferred_element_type=jnp.float32)
        h = jnp.maximum(h + bias_ref[k + 1:k + 2, :], 0.0)

    # Layer 5 (50 -> 1): VPU multiply + cross-lane reduction; padded lanes are zero.
    out = jnp.sum(h * w5_ref[...], axis=-1, keepdims=True) + b5_ref[...]
    o_ref[...] = out.astype(o_ref.dtype)


def _pad2(a, shape):
    """Zero-pad a 2-D array up to `shape`."""
    return jnp.pad(a, [(0, s - d) for d, s in zip(a.shape, shape)])


def prepare_params(params, *, compute_dtype=jnp.bfloat16):
    """One-time pad / cast / pack of the 5 (W, b) pairs (W in (in, out) layout).

    Hoisted out of the forward hot path so the forward is a single pallas_call
    with no surrounding XLA pad/convert ops.
    """
    (w1, b1), (w2, b2), (w3, b3), (w4, b4), (w5, b5) = params

    w1p = _pad2(w1, (IN_FEATURES, H_PAD)).astype(compute_dtype)                  # (500, 128)
    wmid = jnp.stack(
        [_pad2(w, (H_PAD, H_PAD)) for w in (w2, w3, w4)]).astype(compute_dtype)  # (3, 128, 128)
    bias = jnp.stack(
        [jnp.pad(b, (0, H_PAD - b.shape[0])) for b in (b1, b2, b3, b4)]
    ).astype(jnp.float32)                                                        # (4, 128)
    w5row = _pad2(w5.T, (1, H_PAD)).astype(jnp.float32)                          # (1, 128)
    b5p = b5.reshape(1, 1).astype(jnp.float32)                                   # (1, 1)
    return w1p, wmid, bias, w5row, b5p


def fcn_forward(x, prepared, *, tile_b=1024):
    """x: (B, 500) f32 (or bf16).  prepared: output of prepare_params()."""
    B, K = x.shape
    w1p, wmid, bias, w5row, b5p = prepared
    assert K == w1p.shape[0], (K, w1p.shape)

    # Batch tiling: large (8-multiple) tiles amortize per-grid-step overhead;
    # for smaller B shrink the tile but keep >= 2 grid steps when possible so
    # the parallel batch axis can shard across TensorCores (v7x megacore).
    if B < 2 * tile_b:
        if B >= 16:
            half = (B + 1) // 2
            tile_b = ((half + 7) // 8) * 8
        else:
            tile_b = max(8, ((B + 7) // 8) * 8)
    n_tiles = pl.cdiv(B, tile_b)

    weights = (w1p, wmid, bias, w5row, b5p)

    # x / out stream over the batch grid (Pallas double-buffers the x DMA);
    # weights/biases use constant index maps -> fetched once, VMEM-resident.
    x_spec = pl.BlockSpec((tile_b, K), lambda i: (i, 0))
    w_specs = [pl.BlockSpec(a.shape, lambda i, _n=a.ndim: (0,) * _n) for a in weights]
    out_spec = pl.BlockSpec((tile_b, 1), lambda i: (i, 0))

    w_bytes = sum(int(a.size) * jnp.dtype(a.dtype).itemsize for a in weights)
    x_bytes = int(x.size) * jnp.dtype(x.dtype).itemsize
    cost = pl.CostEstimate(
        flops=2 * B * (K * H_PAD + 3 * H_PAD * H_PAD + H_PAD),
        transcendentals=0,
        bytes_accessed=x_bytes + w_bytes + B * 4,
    )

    return pl.pallas_call(
        fcn_kernel,
        out_shape=jax.ShapeDtypeStruct((B, 1), jnp.float32),
        grid_spec=pltpu.PrefetchScalarGridSpec(
            num_scalar_prefetch=0,
            grid=(n_tiles,),
            in_specs=[x_spec] + w_specs,
            out_specs=out_spec,
        ),
        compiler_params=pltpu.CompilerParams(
            # Batch tiles are independent. On v7x, pltpu.CORE_PARALLEL can be
            # used here to force sharding across the two TensorCores.
            dimension_semantics=(pltpu.PARALLEL,),
        ),
        cost_estimate=cost,
    )(x, *weights)


def init_params(key):
    """Deterministic init matching the FCN layer shapes, (in, out) layout."""
    dims = [(500, 100), (100, 100), (100, 100), (100, 50), (50, 1)]
    params = []
    for fan_in, fan_out in dims:
        kw, kb, key = jax.random.split(key, 3)
        bound = 1.0 / jnp.sqrt(fan_in)
        w = jax.random.uniform(kw, (fan_in, fan_out), jnp.float32, -bound, bound)
        b = jax.random.uniform(kb, (fan_out,), jnp.float32, -bound, bound)
        params.append((w, b))
    return params


def reference_forward(x, params):
    h = x
    for i, (w, b) in enumerate(params):
        h = h @ w + b
        if i < len(params) - 1:
            h = jnp.maximum(h, 0.0)
    return h


if __name__ == "__main__":
    key = jax.random.PRNGKey(0)
    kx, kp = jax.random.split(key)

    B = 8
    x = jax.random.normal(kx, (B, 500), jnp.float32)
    params = init_params(kp)

    prepared = prepare_params(params)           # one-time, off the hot path
    out = fcn_forward(x, prepared)
    out = jax.block_until_ready(out)

    ref = reference_forward(x, params)
    assert out.shape == (B, 1), out.shape
    # bf16 inputs/weights with f32 accumulation: loosened tolerance vs f32 ref.
    assert jnp.allclose(out, ref, atol=2e-2, rtol=2e-2), "mismatch vs JAX reference"

    print("KERNEL_OK")
</pallas_src>

<mosaic_0001>
module attributes {stable_mosaic.version = 11 : i64} {
  func.func @fcn_kernel(%arg0: i32, %arg1: memref<8x500xf32, #tpu.memory_space<vmem>>, %arg2: memref<500x128xbf16, #tpu.memory_space<vmem>>, %arg3: memref<3x128x128xbf16, #tpu.memory_space<vmem>>, %arg4: memref<4x128xf32, #tpu.memory_space<vmem>>, %arg5: memref<1x128xf32, #tpu.memory_space<vmem>>, %arg6: memref<1x1xf32, #tpu.memory_space<vmem>>, %arg7: memref<8x1xf32, #tpu.memory_space<vmem>>) attributes {dimension_semantics = [#tpu.dimension_semantics<parallel>], iteration_bounds = array<i64: 1>, scalar_prefetch = 0 : i64, scratch_operands = 0 : i64, tpu.core_type = #tpu.core_type<tc>, window_params = [{transform_indices = @transform_0, window_bounds = array<i64: 8, 500>}, {pipeline_mode = #tpu.pipeline_mode<synchronous>, transform_indices = @transform_1, window_bounds = array<i64: 500, 128>}, {pipeline_mode = #tpu.pipeline_mode<synchronous>, transform_indices = @transform_2, window_bounds = array<i64: 3, 128, 128>}, {pipeline_mode = #tpu.pipeline_mode<synchronous>, transform_indices = @transform_3, window_bounds = array<i64: 4, 128>}, {pipeline_mode = #tpu.pipeline_mode<synchronous>, transform_indices = @transform_4, window_bounds = array<i64: 1, 128>}, {pipeline_mode = #tpu.pipeline_mode<synchronous>, transform_indices = @transform_5, window_bounds = array<i64: 1, 1>}, {transform_indices = @transform_6, window_bounds = array<i64: 8, 1>}]} {
    %c0 = arith.constant 0 : index
    %c0_0 = arith.constant 0 : index
    %0 = vector.load %arg1[%c0, %c0_0] : memref<8x500xf32, #tpu.memory_space<vmem>>, vector<8x500xf32>
    %1 = arith.truncf %0 : vector<8x500xf32> to vector<8x500xbf16>
    %c0_1 = arith.constant 0 : index
    %c0_2 = arith.constant 0 : index
    %2 = vector.load %arg2[%c0_1, %c0_2] : memref<500x128xbf16, #tpu.memory_space<vmem>>, vector<500x128xbf16>
    %cst = arith.constant dense<0.000000e+00> : vector<8x128xf32>
    %3 = tpu.matmul %1, %2, %cst {dimension_numbers = #tpu.dot_dimension_numbers<[1], [0], [0], [1], [0, 0, 1, 1], [], []>} : vector<8x500xbf16>, vector<500x128xbf16>, vector<8x128xf32> -> vector<8x128xf32>
    %c0_3 = arith.constant 0 : index
    %c0_4 = arith.constant 0 : index
    %4 = vector.load %arg4[%c0_3, %c0_4] : memref<4x128xf32, #tpu.memory_space<vmem>>, vector<1x128xf32>
    %5 = vector.broadcast %4 : vector<1x128xf32> to vector<8x128xf32>
    %6 = arith.addf %3, %5 : vector<8x128xf32>
    %cst_5 = arith.constant 0.000000e+00 : f32
    %7 = vector.broadcast %cst_5 : f32 to vector<8x128xf32>
    %8 = arith.maximumf %6, %7 : vector<8x128xf32>
    %9 = arith.truncf %8 : vector<8x128xf32> to vector<8x128xbf16>
    %c0_6 = arith.constant 0 : index
    %c0_7 = arith.constant 0 : index
    %c0_8 = arith.constant 0 : index
    %10 = vector.load %arg3[%c0_6, %c0_7, %c0_8] : memref<3x128x128xbf16, #tpu.memory_space<vmem>>, vector<1x128x128xbf16>
    %11 = vector.shape_cast %10 : vector<1x128x128xbf16> to vector<128x128xbf16>
    %cst_9 = arith.constant dense<0.000000e+00> : vector<8x128xf32>
    %12 = tpu.matmul %9, %11, %cst_9 {dimension_numbers = #tpu.dot_dimension_numbers<[1], [0], [0], [1], [0, 0, 1, 1], [], []>} : vector<8x128xbf16>, vector<128x128xbf16>, vector<8x128xf32> -> vector<8x128xf32>
    %c1 = arith.constant 1 : index
    %c0_10 = arith.constant 0 : index
    %13 = vector.load %arg4[%c1, %c0_10] : memref<4x128xf32, #tpu.memory_space<vmem>>, vector<1x128xf32>
    %14 = vector.broadcast %13 : vector<1x128xf32> to vector<8x128xf32>
    %15 = arith.addf %12, %14 : vector<8x128xf32>
    %cst_11 = arith.constant 0.000000e+00 : f32
    %16 = vector.broadcast %cst_11 : f32 to vector<8x128xf32>
    %17 = arith.maximumf %15, %16 : vector<8x128xf32>
    %18 = arith.truncf %17 : vector<8x128xf32> to vector<8x128xbf16>
    %c1_12 = arith.constant 1 : index
    %c0_13 = arith.constant 0 : index
    %c0_14 = arith.constant 0 : index
    %19 = vector.load %arg3[%c1_12, %c0_13, %c0_14] : memref<3x128x128xbf16, #tpu.memory_space<vmem>>, vector<1x128x128xbf16>
    %20 = vector.shape_cast %19 : vector<1x128x128xbf16> to vector<128x128xbf16>
    %cst_15 = arith.constant dense<0.000000e+00> : vector<8x128xf32>
    %21 = tpu.matmul %18, %20, %cst_15 {dimension_numbers = #tpu.dot_dimension_numbers<[1], [0], [0], [1], [0, 0, 1, 1], [], []>} : vector<8x128xbf16>, vector<128x128xbf16>, vector<8x128xf32> -> vector<8x128xf32>
    %c2 = arith.constant 2 : index
    %c0_16 = arith.constant 0 : index
    %22 = vector.load %arg4[%c2, %c0_16] : memref<4x128xf32, #tpu.memory_space<vmem>>, vector<1x128xf32>
    %23 = vector.broadcast %22 : vector<1x128xf32> to vector<8x128xf32>
    %24 = arith.addf %21, %23 : vector<8x128xf32>
    %cst_17 = arith.constant 0.000000e+00 : f32
    %25 = vector.broadcast %cst_17 : f32 to vector<8x128xf32>
    %26 = arith.maximumf %24, %25 : vector<8x128xf32>
    %27 = arith.truncf %26 : vector<8x128xf32> to vector<8x128xbf16>
    %c2_18 = arith.constant 2 : index
    %c0_19 = arith.constant 0 : index
    %c0_20 = arith.constant 0 : index
    %28 = vector.load %arg3[%c2_18, %c0_19, %c0_20] : memref<3x128x128xbf16, #tpu.memory_space<vmem>>, vector<1x128x128xbf16>
    %29 = vector.shape_cast %28 : vector<1x128x128xbf16> to vector<128x128xbf16>
    %cst_21 = arith.constant dense<0.000000e+00> : vector<8x128xf32>
    %30 = tpu.matmul %27, %29, %cst_21 {dimension_numbers = #tpu.dot_dimension_numbers<[1], [0], [0], [1], [0, 0, 1, 1], [], []>} : vector<8x128xbf16>, vector<128x128xbf16>, vector<8x128xf32> -> vector<8x128xf32>
    %c3 = arith.constant 3 : index
    %c0_22 = arith.constant 0 : index
    %31 = vector.load %arg4[%c3, %c0_22] : memref<4x128xf32, #tpu.memory_space<vmem>>, vector<1x128xf32>
    %32 = vector.broadcast %31 : vector<1x128xf32> to vector<8x128xf32>
    %33 = arith.addf %30, %32 : vector<8x128xf32>
    %cst_23 = arith.constant 0.000000e+00 : f32
    %34 = vector.broadcast %cst_23 : f32 to vector<8x128xf32>
    %35 = arith.maximumf %33, %34 : vector<8x128xf32>
    %c0_24 = arith.constant 0 : index
    %c0_25 = arith.constant 0 : index
    %36 = vector.load %arg5[%c0_24, %c0_25] : memref<1x128xf32, #tpu.memory_space<vmem>>, vector<1x128xf32>
    %37 = vector.broadcast %36 : vector<1x128xf32> to vector<8x128xf32>
    %38 = arith.mulf %35, %37 : vector<8x128xf32>
    %cst_26 = arith.constant dense<0.000000e+00> : vector<8xf32>
    %39 = vector.multi_reduction <add>, %38, %cst_26 [1] : vector<8x128xf32> to vector<8xf32>
    %40 = vector.shape_cast %39 : vector<8xf32> to vector<8x1xf32>
    %c0_27 = arith.constant 0 : index
    %c0_28 = arith.constant 0 : index
    %41 = vector.load %arg6[%c0_27, %c0_28] : memref<1x1xf32, #tpu.memory_space<vmem>>, vector<1x1xf32>
    %42 = vector.broadcast %41 : vector<1x1xf32> to vector<8x1xf32>
    %43 = arith.addf %40, %42 : vector<8x1xf32>
    %c0_29 = arith.constant 0 : index
    %c0_30 = arith.constant 0 : index
    %44 = vector.load %arg7[%c0_29, %c0_30] : memref<8x1xf32, #tpu.memory_space<vmem>>, vector<8x1xf32>
    tpu.vector_store %arg7[%c0_29, %c0_30], %43 {strides = array<i32>} : memref<8x1xf32, #tpu.memory_space<vmem>>, vector<8x1xf32>,
    return
  }
  func.func @transform_0(%arg0: i32) -> (i32, i32) {
    %c0_i32 = arith.constant 0 : i32
    %c0_i32_0 = arith.constant 0 : i32
    return %arg0, %c0_i32 : i32, i32
  }
  func.func @transform_1(%arg0: i32) -> (i32, i32) {
    %c0_i32 = arith.constant 0 : i32
    %c0_i32_0 = arith.constant 0 : i32
    %c0_i32_1 = arith.constant 0 : i32
    return %c0_i32, %c0_i32_0 : i32, i32
  }
  func.func @transform_2(%arg0: i32) -> (i32, i32, i32) {
    %c0_i32 = arith.constant 0 : i32
    %c0_i32_0 = arith.constant 0 : i32
    %c0_i32_1 = arith.constant 0 : i32
    %c0_i32_2 = arith.constant 0 : i32
    return %c0_i32, %c0_i32_0, %c0_i32_1 : i32, i32, i32
  }
  func.func @transform_3(%arg0: i32) -> (i32, i32) {
    %c0_i32 = arith.constant 0 : i32
    %c0_i32_0 = arith.constant 0 : i32
    %c0_i32_1 = arith.constant 0 : i32
    return %c0_i32, %c0_i32_0 : i32, i32
  }
  func.func @transform_4(%arg0: i32) -> (i32, i32) {
    %c0_i32 = arith.constant 0 : i32
    %c0_i32_0 = arith.constant 0 : i32
    %c0_i32_1 = arith.constant 0 : i32
    return %c0_i32, %c0_i32_0 : i32, i32
  }
  func.func @transform_5(%arg0: i32) -> (i32, i32) {
    %c0_i32 = arith.constant 0 : i32
    %c0_i32_0 = arith.constant 0 : i32
    %c0_i32_1 = arith.constant 0 : i32
    return %c0_i32, %c0_i32_0 : i32, i32
  }
  func.func @transform_6(%arg0: i32) -> (i32, i32) {
    %c0_i32 = arith.constant 0 : i32
    %c0_i32_0 = arith.constant 0 : i32
    return %arg0, %c0_i32 : i32, i32
  }
}

</mosaic_0001>

<bundles_post_ra>
// kernel: tpu_custom_call.1
= control target key start
LH: loop header
LB: loop body
LE: loop exit
PB: predicated region body
PF: predicated region fallthrough
CT: control target
= control target key end

     0   :  { %s1204_s0 = inlined_call_operand.hbm [shape: f32[8,500], index: 0, kind: input, shape index: {}]   ;;  %s1205_s1 = inlined_call_operand.hbm [shape: bf16[500,128], index: 1, kind: input, shape index: {}]   ;;  %s1206_s2 = inlined_call_operand.hbm [shape: bf16[3,128,128], index: 2, kind: input, shape index: {}]   ;;  %s1207_s3 = inlined_call_operand.vmem [shape: f32[4,128], index: 3, kind: input, shape index: {}]   ;;  %s1208_s4 = inlined_call_operand.vmem [shape: f32[1,128], index: 4, kind: input, shape index: {}]   ;;  %s1209_s5 = inlined_call_operand.<no memory space> [shape: f32[1,1], index: 5, kind: input, shape index: {}]   ;;  %s1210_s6 = inlined_call_operand.vmem [shape: f32[8,1], index: 6, kind: output, shape index: {}]  }
   0x1   :  { %v11_v0 = vstv %s1209_s5 }
   0x2   :  { %12 = vst [vmem:[#allocation2] sm:$0x1] %v11_v0 }
   0x3   :  { %13 = vsyncpa [#allocation4], 0 }
   0x4   :  { %14 = vsyncpa [#allocation6], 0  ;;  %s1102_s23 = smov [#allocation5]  }
   0x5   :  { %s30_s24 = sshll.u32 %s1102_s23, 4  ;;  %s31_s24 = int_to_ptr.vmem [resolvable:$true] %s30_s24 }
   0x6   :  { %s1046_s25 = scalar_lea.vmem %s31_s24, 4032  ;;  %p1051_p1 = scmp.lt.s32.totalorder %s31_s24, %s31_s24 }
   0x7   :  { %p1047_p0 = scmp.ne.s32.totalorder %s31_s24, %s1046_s25  ;;  %p1052_p2 = scmp.lt.s32.totalorder %s1046_s25, %s1046_s25 }
   0x9   :  { %p1053_p3 = por %p1052_p2, %p1051_p1 }
   0xb   :  { %p1054_p4 = pnand %p1053_p3, %p1047_p0 }
   0xd   :  { %1057 = shalt.err (!%p1054_p4)
}
   0xe   :  { %s1103_s26 = smov 64   ;;  %s1104_s27 = smov 4  }
   0xf   :  { %36 = dma.hbm_to_vmem [thread:$0]  %s1205_s1, 4032, %s31_s24, [#allocation6], %s1103_s26, %s1103_s26, %s1104_s27  }
  0x10   :  { %s1105_s5 = smov [#allocation3]   ;;  %s1106_s7 = smov [#allocation7]  }
  0x11   :  { %s21_s30 = sshll.u32 %s1105_s5, 4  ;;  %s42_s8 = sshll.u32 %s1106_s7, 4  ;;  %s22_s30 = int_to_ptr.vmem [resolvable:$true] %s21_s30  ;;  %s43_s8 = int_to_ptr.vmem [resolvable:$true] %s42_s8 }
  0x12   :  { %s1066_s9 = scalar_lea.vmem %s22_s30, 512  ;;  %p1071_p6 = scmp.lt.s32.totalorder %s22_s30, %s22_s30 }
  0x13   :  { %p1067_p5 = scmp.ne.s32.totalorder %s22_s30, %s1066_s9  ;;  %p1072_p7 = scmp.lt.s32.totalorder %s1066_s9, %s1066_s9 }
  0x15   :  { %p1073_p8 = por %p1072_p7, %p1071_p6 }
  0x17   :  { %p1074_p9 = pnand %p1073_p8, %p1067_p5 }
  0x19   :  { %1077 = shalt.err (!%p1074_p9)
}
  0x1a   :  { %24 = dma.hbm_to_vmem [thread:$0]  %s1204_s0, 512, %s22_s30, [#allocation4]  }
  0x1b   :  { %s1086_s12 = scalar_lea.vmem %s43_s8, 3072  ;;  %p1091_p11 = scmp.lt.s32.totalorder %s43_s8, %s43_s8 }
  0x1c   :  { %p1087_p10 = scmp.ne.s32.totalorder %s43_s8, %s1086_s12  ;;  %p1092_p12 = scmp.lt.s32.totalorder %s1086_s12, %s1086_s12 }
  0x1e   :  { %p1093_p13 = por %p1092_p12, %p1091_p11 }
  0x20   :  { %p1094_p0 = pnand %p1093_p13, %p1087_p10 }
  0x22   :  { %1097 = shalt.err (!%p1094_p0)
}
  0x23   :  { %48 = dma.hbm_to_vmem [thread:$0]  %s1206_s2, 3072, %s43_s8, [#allocation6], %s1103_s26, %s1103_s26, %s1104_s27  }
  0x24   :  { %1098 = dma.done.wait [#allocation4], 512  }
  0x25   :  { %1099 = vsyncadd [#allocation4], 4294966784 }
  0x26   :  { %1100 = dma.done.wait [#allocation6], 7104  }
  0x27   :  { %1101 = vsyncadd [#allocation6], 4294960192  ;;  %v982_v1 = vld [vmem:[#allocation5 + $0x78] sm:$0xff]   ;;  %vm334_vm0 = vcmask 1041408   ;;  %v986_v5 = vld [vmem:[#allocation5 + $0x70] sm:$0xff]   ;;  %vm330_vm1 = vcmask 949248  }
  0x28   :  { %v983_v2 = vld [vmem:[#allocation5 + $0xf8] ss:$0 sps:$4 sm:$0x33]   ;;  %843 = vmatprep.subr.bf16.mxu0 %v982_v1  ;;  %v987_v6 = vld [vmem:[#allocation5 + $0xf0] sm:$0xff]   ;;  %v990_v9 = vld [vmem:[#allocation5 + $0x68] sm:$0xff]   ;;  %v1107_v41 = vmov 0.0  }
  0x29   :  { %v984_v3 = vld [vmem:[#allocation5 + $0x38] sm:$0xff]   ;;  %974 = vmatprep.subr.msk.bf16.mxu1 %vm334_vm0, %v983_v2  ;;  %v988_v7 = vld [vmem:[#allocation5 + $0x30] sm:$0xff]   ;;  %v991_v10 = vld [vmem:[#allocation5 + $0xe8] sm:$0xff]   ;;  %vm1108_vm2 = vmmov 0   ;;  %vm772_vm3 = vcmask 7168  }
  0x2a   :  { %844 = vmatpush3.bf16.msra.mxu0 %v984_v3  ;;  %v985_v4 = vld [vmem:[#allocation5 + $0xb8] sm:$0xff]   ;;  %v989_v8 = vld [vmem:[#allocation5 + $0xb0] sm:$0xff]   ;;  %v992_v11 = vld [vmem:[#allocation5 + $0x28] sm:$0xff]  }
  0x2b   :  { %866 = vmatpush3.bf16.msra.mxu1 %v985_v4  ;;  %845 = vmatprep.subr.bf16.mxu0 %v986_v5  ;;  %v993_v12 = vld [vmem:[#allocation5 + $0xa8] sm:$0xff]   ;;  %v994_v13 = vld [vmem:[#allocation5 + $0x60] sm:$0xff]   ;;  %v998_v17 = vld [vmem:[#allocation5 + $0x58] sm:$0xff]  }
  0x2c   :  { %867 = vmatprep.subr.bf16.mxu1 %v987_v6  ;;  %v995_v14 = vld [vmem:[#allocation5 + $0xe0] sm:$0xff]   ;;  %v999_v18 = vld [vmem:[#allocation5 + $0xd8] sm:$0xff]   ;;  %v1002_v21 = vld [vmem:[#allocation5 + $0x50] sm:$0xff]  }
  0x2d   :  { %v996_v15 = vld [vmem:[#allocation5 + $0x20] sm:$0xff]   ;;  %v1000_v19 = vld [vmem:[#allocation5 + $0x18] sm:$0xff]   ;;  %v1003_v22 = vld [vmem:[#allocation5 + $0xd0] sm:$0xff]  }
  0x2e   :  { %846 = vmatpush3.bf16.msra.mxu0 %v988_v7  ;;  %v997_v16 = vld [vmem:[#allocation5 + $0xa0] sm:$0xff]   ;;  %v1001_v20 = vld [vmem:[#allocation5 + $0x98] sm:$0xff]   ;;  %v1004_v23 = vld [vmem:[#allocation5 + $0x10] sm:$0xff]  }
  0x2f   :  { %868 = vmatpush3.bf16.msra.mxu1 %v989_v8  ;;  %847 = vmatprep.subr.bf16.mxu0 %v990_v9  ;;  %v1005_v24 = vld [vmem:[#allocation5 + $0x90] sm:$0xff]   ;;  %v1006_v25 = vld [vmem:[#allocation5 + $0x48] sm:$0xff]   ;;  %v1010_v29 = vld [vmem:[#allocation5 + $0x40] sm:$0xff]  }
  0x30   :  { %869 = vmatprep.subr.bf16.mxu1 %v991_v10  ;;  %v1007_v26 = vld [vmem:[#allocation5 + $0xc8] sm:$0xff]   ;;  %v1011_v30 = vld [vmem:[#allocation5 + $0xc0] sm:$0xff]   ;;  %v68_v35 = vld [vmem:[#allocation3 + $0x18] sm:$0xff] }
  0x31   :  { %v1008_v27 = vld [vmem:[#allocation5 + $0x8] sm:$0xff]   ;;  %v1012_v31 = vld [vmem:[#allocation5] sm:$0xff]   ;;  %v67_v37 = vld [vmem:[#allocation3 + $0x10] sm:$0xff]  ;;  %v72_v38 = vpack.c.bf16 %v68_v35, %v68_v35 }
  0x32   :  { %848 = vmatpush3.bf16.msra.mxu0 %v992_v11  ;;  %v1009_v28 = vld [vmem:[#allocation5 + $0x88] sm:$0xff]   ;;  %v1013_v32 = vld [vmem:[#allocation5 + $0x80] sm:$0xff]   ;;  %v71_v40 = vpack.c.bf16 %v67_v37, %v67_v37  ;;  %v1014_v42 = vld [vmem:[#allocation7 + $0x38] sm:$0xff]  }
  0x33   :  { %870 = vmatpush3.bf16.msra.mxu1 %v993_v12  ;;  %849 = vmatprep.subr.bf16.mxu0 %v994_v13  ;;  %v66_v33 = vld [vmem:[#allocation3 + $0x8] sm:$0xff]  ;;  %v65_v36 = vld [vmem:[#allocation3] sm:$0xff]  ;;  %v1018_v46 = vld [vmem:[#allocation7 + $0x18] sm:$0xff]  }
  0x34   :  { %871 = vmatprep.subr.bf16.mxu1 %v995_v14  ;;  %v70_v34 = vpack.c.bf16 %v66_v33, %v66_v33  ;;  %v69_v39 = vpack.c.bf16 %v65_v36, %v65_v36  ;;  %813 = vmatprep.mubr.msk.bf16.mxu1 %vm330_vm1, %v72_v38  ;;  %v1015_v43 = vld [vmem:[#allocation7 + $0x30] sm:$0xff]   ;;  %v1016_v44 = vld [vmem:[#allocation7 + $0x28] sm:$0xff]   ;;  %v1017_v45 = vld [vmem:[#allocation7 + $0x20] sm:$0xff]  }
  0x35   :  { %v1019_v47 = vld [vmem:[#allocation7 + $0x10] sm:$0xff]   ;;  %v1020_v48 = vld [vmem:[#allocation7 + $0x8] sm:$0xff]   ;;  %v1021_v49 = vld [vmem:[#allocation7] sm:$0xff]  }
  0x36   :  { %850 = vmatpush3.bf16.msra.mxu0 %v996_v15  ;;  %370 = vmatprep.mubr.bf16.mxu0 %v70_v34  ;;  %v1022_v50 = vld [vmem:[#allocation7 + $0x78] sm:$0xff]   ;;  %v1023_v51 = vld [vmem:[#allocation7 + $0x70] sm:$0xff]   ;;  %v1024_v52 = vld [vmem:[#allocation7 + $0x68] sm:$0xff]  }
  0x37   :  { %872 = vmatpush3.bf16.msra.mxu1 %v997_v16  ;;  %851 = vmatprep.subr.bf16.mxu0 %v998_v17  ;;  %v1025_v53 = vld [vmem:[#allocation7 + $0x60] sm:$0xff]   ;;  %v1026_v54 = vld [vmem:[#allocation7 + $0x58] sm:$0xff]   ;;  %v1027_v55 = vld [vmem:[#allocation7 + $0x50] sm:$0xff]  }
  0x38   :  { %873 = vmatprep.subr.bf16.mxu1 %v999_v18  ;;  %v780_v58 = vld [vmem:[%s1207_s3] ss:$0 sm:$0xff]  ;;  %v1028_v7 = vld [vmem:[#allocation7 + $0x48] sm:$0xff]   ;;  %v1030_v9 = vld [vmem:[#allocation7 + $0xb8] sm:$0xff]  }
  0x39   :  { %v1029_v8 = vld [vmem:[#allocation7 + $0x40] sm:$0xff]   ;;  %v1031_v10 = vld [vmem:[#allocation7 + $0xb0] sm:$0xff]   ;;  %v1032_v11 = vld [vmem:[#allocation7 + $0xa8] sm:$0xff]  }
  0x3a   :  { %852 = vmatpush3.bf16.msra.mxu0 %v1000_v19  ;;  %v1033_v12 = vld [vmem:[#allocation7 + $0xa0] sm:$0xff]   ;;  %v1034_v13 = vld [vmem:[#allocation7 + $0x98] sm:$0xff]   ;;  %v1035_v14 = vld [vmem:[#allocation7 + $0x90] sm:$0xff]  }
  0x3b   :  { %874 = vmatpush3.bf16.msra.mxu1 %v1001_v20  ;;  %853 = vmatprep.subr.bf16.mxu0 %v1002_v21  ;;  %v814_v15 = vld [vmem:[%s1207_s3 + $0x1] ss:$0 sm:$0xff]  ;;  %v832_v33 = vld [vmem:[%s1207_s3 + $0x3] ss:$0 sm:$0xff]  ;;  %v841_v37 = vld [vmem:[%s1208_s4] ss:$0 sm:$0xff] }
  0x3c   :  { %875 = vmatprep.subr.bf16.mxu1 %v1003_v22 }
  0x3e   :  { %854 = vmatpush3.bf16.msra.mxu0 %v1004_v23  ;;  %v1036_v23 = vld [vmem:[#allocation7 + $0x88] sm:$0xff]  }
  0x3f   :  { %876 = vmatpush3.bf16.msra.mxu1 %v1005_v24  ;;  %855 = vmatprep.subr.bf16.mxu0 %v1006_v25  ;;  %v1037_v24 = vld [vmem:[#allocation7 + $0x80] sm:$0xff]  }
  0x40   :  { %877 = vmatprep.subr.bf16.mxu1 %v1007_v26  ;;  %v823_v25 = vld [vmem:[%s1207_s3 + $0x2] ss:$0 sm:$0xff] }
  0x42   :  { %856 = vmatpush3.bf16.msra.mxu0 %v1008_v27 }
  0x43   :  { %878 = vmatpush3.bf16.msra.mxu1 %v1009_v28  ;;  %857 = vmatprep.subr.bf16.mxu0 %v1010_v29 }
  0x44   :  { %879 = vmatprep.subr.bf16.mxu1 %v1011_v30 }
  0x46   :  { %858 = vmatpush3.bf16.msra.mxu0 %v1012_v31 }
  0x47   :  { %880 = vmatpush3.bf16.msra.mxu1 %v1013_v32  ;;  %914 = vmatprep.subr.bf16.mxu0 %v1107_v41 }
  0x48   :  { %934 = vmatprep.subr.bf16.mxu1 %v1107_v41 }
  0x49   :  { %371 = vmatmul.mubr.bf16.vlgmr.msra.gmra.mxu0 %v69_v39 }
  0x4a   :  { %411 = vmatmul.mubr.bf16.vlgmr.msra.gmra.mxu1 %v71_v40  ;;  %915 = vmatpush3.bf16.msra.mxu0 %v1014_v42  ;;  %v842_v42 = vld [vmem:[#allocation2] ss:$0 sm:$0xff] }
  0x4b   :  { %916 = vmatprep.subr.bf16.mxu0 %v1107_v41  ;;  %930 = vmatprep.mubr.msk.bf16.mxu0 %vm1108_vm2, %v1107_v41 }
  0x4c   :  { %950 = vmatprep.mubr.msk.bf16.mxu1 %vm1108_vm2, %v1107_v41  ;;  %935 = vmatpush3.bf16.msra.mxu1 %v1022_v50 }
  0x4d   :  { %936 = vmatprep.subr.bf16.mxu1 %v1107_v41 }
  0x4e   :  { %917 = vmatpush3.bf16.msra.mxu0 %v1015_v43 }
  0x4f   :  { %918 = vmatprep.subr.bf16.mxu0 %v1107_v41 }
  0x50   :  { %937 = vmatpush3.bf16.msra.mxu1 %v1023_v51 }
  0x51   :  { %938 = vmatprep.subr.bf16.mxu1 %v1107_v41 }
  0x52   :  { %919 = vmatpush3.bf16.msra.mxu0 %v1016_v44 }
  0x53   :  { %920 = vmatprep.subr.bf16.mxu0 %v1107_v41 }
  0x54   :  { %939 = vmatpush3.bf16.msra.mxu1 %v1024_v52 }
  0x55   :  { %940 = vmatprep.subr.bf16.mxu1 %v1107_v41 }
  0x56   :  { %921 = vmatpush3.bf16.msra.mxu0 %v1017_v45 }
  0x57   :  { %922 = vmatprep.subr.bf16.mxu0 %v1107_v41 }
  0x58   :  { %941 = vmatpush3.bf16.msra.mxu1 %v1025_v53 }
  0x59   :  { %942 = vmatprep.subr.bf16.mxu1 %v1107_v41 }
  0x5a   :  { %923 = vmatpush3.bf16.msra.mxu0 %v1018_v46 }
  0x5b   :  { %924 = vmatprep.subr.bf16.mxu0 %v1107_v41 }
  0x5c   :  { %943 = vmatpush3.bf16.msra.mxu1 %v1026_v54 }
  0x5d   :  { %944 = vmatprep.subr.bf16.mxu1 %v1107_v41 }
  0x5e   :  { %925 = vmatpush3.bf16.msra.mxu0 %v1019_v47 }
  0x5f   :  { %926 = vmatprep.subr.bf16.mxu0 %v1107_v41 }
  0x60   :  { %945 = vmatpush3.bf16.msra.mxu1 %v1027_v55 }
  0x61   :  { %946 = vmatprep.subr.bf16.mxu1 %v1107_v41 }
  0x62   :  { %927 = vmatpush3.bf16.msra.mxu0 %v1020_v48 }
  0x63   :  { %928 = vmatprep.subr.bf16.mxu0 %v1107_v41 }
  0x64   :  { %947 = vmatpush3.bf16.msra.mxu1 %v1028_v7 }
  0x65   :  { %948 = vmatprep.subr.bf16.mxu1 %v1107_v41 }
  0x66   :  { %929 = vmatpush3.bf16.msra.mxu0 %v1021_v49 }
  0x67   :  { %954 = vmatprep.subr.bf16.mxu0 %v1107_v41 }
  0x68   :  { %949 = vmatpush3.bf16.msra.mxu1 %v1029_v8 }
 0x109   :  { %v859_v56 = vpop.f32.mrf.mxu0 }
 0x10a   :  { %v881_v57 = vpop.f32.mrf.mxu1 }
 0x10b   :  { %v860_v59 = vpop.f32.mrf.mxu0 }
 0x10c   :  { %v861_v60 = vadd.f32 %v860_v59, %v859_v56  ;;  %v882_v61 = vpop.f32.mrf.mxu1 }
 0x10d   :  { %v862_v62 = vpop.f32.mrf.mxu0  ;;  %v883_v0 = vadd.f32 %v882_v61, %v881_v57 }
 0x10e   :  { %v373_v63 = vadd.f32 %v861_v60, %v780_v58  ;;  %v884_v1 = vpop.f32.mrf.mxu1 }
 0x10f   :  { %v863_v2 = vpop.f32.mrf.mxu0 }
 0x110   :  { %v413_v3 = vadd.f32 %v883_v0, %v373_v63  ;;  %v885_v4 = vpop.f32.mrf.mxu1 }
 0x112   :  { %v418_v5 = vmax.f32 %v413_v3, 0.0 }
 0x114   :  { %v419_v6 = vpack.c.bf16 %v418_v5, %v418_v5 }
 0x116   :  { %931 = vmatmul.mubr.bf16.vlgmr.msra.gmra.mxu0 %v419_v6 }
 0x117   :  { %970 = vmatprep.mubr.msk.bf16.mxu0 %vm1108_vm2, %v1107_v41  ;;  %955 = vmatpush3.bf16.msra.mxu0 %v1030_v9 }
 0x118   :  { %956 = vmatprep.subr.bf16.mxu0 %v1107_v41 }
 0x11b   :  { %957 = vmatpush3.bf16.msra.mxu0 %v1031_v10 }
 0x11c   :  { %958 = vmatprep.subr.bf16.mxu0 %v1107_v41 }
 0x11f   :  { %959 = vmatpush3.bf16.msra.mxu0 %v1032_v11 }
 0x120   :  { %960 = vmatprep.subr.bf16.mxu0 %v1107_v41 }
 0x123   :  { %961 = vmatpush3.bf16.msra.mxu0 %v1033_v12 }
 0x124   :  { %962 = vmatprep.subr.bf16.mxu0 %v1107_v41 }
 0x127   :  { %963 = vmatpush3.bf16.msra.mxu0 %v1034_v13 }
 0x128   :  { %964 = vmatprep.subr.bf16.mxu0 %v1107_v41 }
 0x12b   :  { %965 = vmatpush3.bf16.msra.mxu0 %v1035_v14 }
 0x12c   :  { %966 = vmatprep.subr.bf16.mxu0 %v1107_v41 }
 0x12f   :  { %967 = vmatpush3.bf16.msra.mxu0 %v1036_v23 }
 0x130   :  { %968 = vmatprep.subr.bf16.mxu0 %v1107_v41 }
 0x133   :  { %969 = vmatpush3.bf16.msra.mxu0 %v1037_v24 }
 0x1d6   :  { %v523_v16 = vpop.f32.mrf.mxu0 }
 0x1d7   :  { %v524_v17 = vadd.f32 %v814_v15, %v523_v16 }
 0x1d8   :  { %v932_v18 = vpop.f32.mrf.mxu0 }
 0x1d9   :  { %v529_v19 = vmax.f32 %v524_v17, 0.0 }
 0x1da   :  { %v526_v20 = vpop.f32.mrf.mxu0 }
 0x1db   :  { %v530_v21 = vpack.c.bf16 %v529_v19, %v529_v19 }
 0x1dc   :  { %v933_v22 = vpop.f32.mrf.mxu0 }
 0x1dd   :  { %951 = vmatmul.mubr.bf16.vlgmr.msra.gmra.mxu1 %v530_v21 }
 0x29d   :  { %v635_v26 = vpop.f32.mrf.mxu1 }
 0x29e   :  { %v636_v27 = vadd.f32 %v823_v25, %v635_v26 }
 0x29f   :  { %v952_v28 = vpop.f32.mrf.mxu1 }
 0x2a0   :  { %v641_v29 = vmax.f32 %v636_v27, 0.0 }
 0x2a1   :  { %v638_v30 = vpop.f32.mrf.mxu1 }
 0x2a2   :  { %v642_v31 = vpack.c.bf16 %v641_v29, %v641_v29 }
 0x2a3   :  { %v953_v32 = vpop.f32.mrf.mxu1 }
 0x2a4   :  { %971 = vmatmul.mubr.bf16.vlgmr.msra.gmra.mxu0 %v642_v31 }
 0x364   :  { %v747_v34 = vpop.f32.mrf.mxu0 }
 0x365   :  { %v748_v35 = vadd.f32 %v832_v33, %v747_v34 }
 0x366   :  { %v972_v36 = vpop.f32.mrf.mxu0 }
 0x367   :  { %v753_v38 = vmax.f32 %v748_v35, 0.0 }
 0x368   :  { %v750_v39 = vpop.f32.mrf.mxu0 }
 0x369   :  { %v761_v40 = vmul.f32 %v841_v37, %v753_v38 }
 0x36a   :  { %v973_v41 = vpop.f32.mrf.mxu0 }
 0x36b   :  { %762 = vadd.xlane.f32.xlu0 %v761_v40 }
 0x3f4   :  { %v763_v43 = vpop.xlane.xlu0 %762 }
 0x3f5   :  { %v771_v44 = vadd.f32 %v842_v42, %v763_v43 }
 0x3f7   :  { %773 = vst.msk [vmem:[%s1210_s6] sm:$0xff] %vm772_vm3, %v771_v44 }
 0x3f8   :  { %778 = vsyncpa [#allocation4], 1 }
 0x3f9   :  { %779 = vsyncpa [#allocation6], 1 }

</bundles_post_ra>
